<compile_context>
chip_gen: v7x
topology: tpu7x:2x2x1
jax: 0.10.0
libtpu: 0.0.40
codegen_flags: <defaults>
</compile_context>

<pallas_src>
import math

import jax
import jax.numpy as jnp
from jax.experimental import pallas as pl
from jax.experimental.pallas import tpu as pltpu


def _emb_kernel(x_ref, w_ref, o_ref):
    # x_ref: (1, tile_b) f32         -- batch along lanes (fast axis)
    # w_ref: (half_dim, 1) f32       -- features along sublanes
    # o_ref: (dim+1, tile_b) f32     -- rows = [x ; sin(freqs) ; cos(freqs)]
    x = x_ref[...]                              # (1, tile_b)
    w2pi = w_ref[...] * (2.0 * math.pi)         # (half_dim, 1), hoisted 2*pi scale
    freqs = w2pi * x                            # VPU broadcast -> (half_dim, tile_b)
    out = jnp.concatenate(                      # sublane concat, lane-dense slab
        [x, jnp.sin(freqs), jnp.cos(freqs)], axis=0)
    o_ref[...] = out.astype(o_ref.dtype)        # single full (dim+1, tile_b) store


def _jnp_forward(x, weights):
    """Fused-XLA reference / small-batch fast path."""
    x = x.astype(jnp.float32)[:, None]
    freqs = x * weights.astype(jnp.float32)[None, :] * (2.0 * math.pi)
    return jnp.concatenate([x, jnp.sin(freqs), jnp.cos(freqs)], axis=-1)


def _round_up(v, m):
    return ((v + m - 1) // m) * m


def learned_sinusoidal_pos_emb(
    x,
    weights,
    *,
    max_tile_b=32768,
    min_pallas_batch=2048,
    transposed=False,
):
    """x: (b,) float, weights: (half_dim,) float -> (b, 2*half_dim + 1) f32.

    With transposed=True returns the kernel-native (2*half_dim + 1, b) slab
    (rows = [x | sin | cos]) so the consumer can absorb the transpose.
    """
    assert x.ndim == 1 and weights.ndim == 1
    b = x.shape[0]
    half_dim = weights.shape[0]
    dim = 2 * half_dim

    # Small-batch fast path: launch + per-step overheads and lane-sparse stores
    # dominate below a couple thousand rows; fused XLA elementwise wins there.
    if b < min_pallas_batch:
        out = _jnp_forward(x, weights)
        return out.T if transposed else out

    x32 = x.astype(jnp.float32)
    w32 = weights.astype(jnp.float32)
    x_row = x32.reshape(1, b)                   # batch on lanes
    w_col = w32.reshape(half_dim, 1)            # features on sublanes

    # --- batch tile selection -------------------------------------------------
    # Budget per-step blocks to a few MiB so 2x double-buffered in+out fit
    # easily in v5e's 16 MiB default scoped VMEM and v7x's 64 MiB physical
    # VMEM, while each step writes enough (>~0.5-1 MiB) to amortize the
    # ~0.35 us/grid-step pipeline overhead.
    budget_bytes = 6 * 1024 * 1024
    bytes_per_elem = 4 * (dim + 2)              # (dim+1)-row output + 1-row input
    tile_cap = max(128, (budget_bytes // bytes_per_elem) // 128 * 128)
    tile_b = min(max_tile_b, tile_cap)
    # Keep >= 2 grid steps so ("parallel",) can split the batch across v7x's
    # two TensorCores.
    tile_b = min(tile_b, _round_up(pl.cdiv(b, 2), 128))
    tile_b = max(tile_b, 128)
    if b <= tile_b:
        tile_b = b                              # single full-extent block
    grid = (pl.cdiv(b, tile_b),)

    # Explicit VMEM budget: double-buffered in+out blocks plus headroom,
    # capped well under every generation's physical VMEM.
    block_bytes = 4 * (tile_b * (dim + 2) + half_dim)
    vmem_limit = int(min(48 * 1024 * 1024, max(8 * 1024 * 1024, 3 * block_bytes)))

    # Honest estimate: no wrapper concat any more, so kernel traffic ~= total.
    cost = pl.CostEstimate(
        flops=2 * b * half_dim,
        transcendentals=2 * b * half_dim,
        bytes_accessed=4 * (b + half_dim + (dim + 1) * b),
    )

    out_db = pl.pallas_call(
        _emb_kernel,
        out_shape=jax.ShapeDtypeStruct((dim + 1, b), jnp.float32),
        grid_spec=pltpu.PrefetchScalarGridSpec(
            num_scalar_prefetch=0,
            grid=grid,
            in_specs=[
                pl.BlockSpec((1, tile_b), lambda i: (0, i)),
                pl.BlockSpec((half_dim, 1), lambda i: (0, 0)),
            ],
            out_specs=pl.BlockSpec((dim + 1, tile_b), lambda i: (0, i)),
        ),
        compiler_params=pltpu.CompilerParams(
            dimension_semantics=("parallel",),
            vmem_limit_bytes=vmem_limit,
        ),
        cost_estimate=cost,
    )(x_row, w_col)                             # (dim+1, b), rows = [x | sin | cos]

    if transposed:
        return out_db
    # Layout plumbing to match PyTorch's (b, dim+1). If the consumer is a
    # Linear/MLP, call with transposed=True and contract over the leading axis
    # to fold this transpose into its matmul for free.
    return out_db.T


if __name__ == "__main__":
    key = jax.random.PRNGKey(0)
    k_w, k_x, k_x2 = jax.random.split(key, 3)

    # Small shapes consistent with the module: dim=16 -> half_dim=8, batch=8.
    dim = 16
    half_dim = dim // 2
    batch = 8

    weights = jax.random.normal(k_w, (half_dim,), dtype=jnp.float32)
    x = jax.random.uniform(k_x, (batch,), dtype=jnp.float32)
    ref = _jnp_forward(x, weights)

    # Force the Pallas path at the small module-scale shape (single block).
    out = learned_sinusoidal_pos_emb(x, weights, min_pallas_batch=1)
    out = jax.block_until_ready(out)
    assert out.shape == (batch, dim + 1)
    assert jnp.allclose(out, ref, atol=1e-5, rtol=1e-5)

    # Tiled / remainder / megacore path (grid > 1, b not a tile multiple).
    batch2 = 66_000
    x2 = jax.random.uniform(k_x2, (batch2,), dtype=jnp.float32)
    out2 = jax.block_until_ready(learned_sinusoidal_pos_emb(x2, weights))
    ref2 = _jnp_forward(x2, weights)
    assert out2.shape == (batch2, dim + 1)
    assert jnp.allclose(out2, ref2, atol=1e-5, rtol=1e-5)

    # Transposed kernel-native layout (consumer folds the transpose).
    out2_t = jax.block_until_ready(
        learned_sinusoidal_pos_emb(x2, weights, transposed=True))
    assert out2_t.shape == (dim + 1, batch2)
    assert jnp.allclose(out2_t.T, ref2, atol=1e-5, rtol=1e-5)

    # Small-batch fast path (pure jnp, default threshold).
    out3 = jax.block_until_ready(learned_sinusoidal_pos_emb(x, weights))
    assert jnp.allclose(out3, ref, atol=1e-5, rtol=1e-5)

    print("KERNEL_OK")
</pallas_src>

<mosaic_0001>
module attributes {stable_mosaic.version = 11 : i64} {
  func.func @_emb_kernel(%arg0: i32, %arg1: memref<1x8xf32, #tpu.memory_space<vmem>>, %arg2: memref<8x1xf32, #tpu.memory_space<vmem>>, %arg3: memref<17x8xf32, #tpu.memory_space<vmem>>) attributes {dimension_semantics = [#tpu.dimension_semantics<parallel>], iteration_bounds = array<i64: 1>, scalar_prefetch = 0 : i64, scratch_operands = 0 : i64, tpu.core_type = #tpu.core_type<tc>, window_params = [{transform_indices = @transform_0, window_bounds = array<i64: 1, 8>}, {pipeline_mode = #tpu.pipeline_mode<synchronous>, transform_indices = @transform_1, window_bounds = array<i64: 8, 1>}, {transform_indices = @transform_2, window_bounds = array<i64: 17, 8>}]} {
    %c0 = arith.constant 0 : index
    %c0_0 = arith.constant 0 : index
    %0 = vector.load %arg1[%c0, %c0_0] : memref<1x8xf32, #tpu.memory_space<vmem>>, vector<1x8xf32>
    %c0_1 = arith.constant 0 : index
    %c0_2 = arith.constant 0 : index
    %1 = vector.load %arg2[%c0_1, %c0_2] : memref<8x1xf32, #tpu.memory_space<vmem>>, vector<8x1xf32>
    %cst = arith.constant 6.28318548 : f32
    %2 = vector.broadcast %cst : f32 to vector<8x1xf32>
    %3 = arith.mulf %1, %2 : vector<8x1xf32>
    %4 = vector.broadcast %3 : vector<8x1xf32> to vector<8x8xf32>
    %5 = vector.broadcast %0 : vector<1x8xf32> to vector<8x8xf32>
    %6 = arith.mulf %4, %5 : vector<8x8xf32>
    %7 = math.sin %6 : vector<8x8xf32>
    %8 = math.cos %6 : vector<8x8xf32>
    %9 = tpu.concatenate %0, %7, %8 in 0 : vector<1x8xf32>, vector<8x8xf32>, vector<8x8xf32> -> vector<17x8xf32>
    %c0_3 = arith.constant 0 : index
    %c0_4 = arith.constant 0 : index
    %10 = vector.load %arg3[%c0_3, %c0_4] : memref<17x8xf32, #tpu.memory_space<vmem>>, vector<17x8xf32>
    tpu.vector_store %arg3[%c0_3, %c0_4], %9 {strides = array<i32>} : memref<17x8xf32, #tpu.memory_space<vmem>>, vector<17x8xf32>,
    return
  }
  func.func @transform_0(%arg0: i32) -> (i32, i32) {
    %c0_i32 = arith.constant 0 : i32
    %c0_i32_0 = arith.constant 0 : i32
    return %c0_i32, %arg0 : i32, i32
  }
  func.func @transform_1(%arg0: i32) -> (i32, i32) {
    %c0_i32 = arith.constant 0 : i32
    %c0_i32_0 = arith.constant 0 : i32
    %c0_i32_1 = arith.constant 0 : i32
    return %c0_i32, %c0_i32_0 : i32, i32
  }
  func.func @transform_2(%arg0: i32) -> (i32, i32) {
    %c0_i32 = arith.constant 0 : i32
    %c0_i32_0 = arith.constant 0 : i32
    return %c0_i32, %arg0 : i32, i32
  }
}

</mosaic_0001>

<bundles_post_ra>
// kernel: tpu_custom_call.1
= control target key start
LH: loop header
LB: loop body
LE: loop exit
PB: predicated region body
PF: predicated region fallthrough
CT: control target
= control target key end

     0   :  { %v275_v0 = vmov 0   ;;  %v20_v3 = vlaneseq  ;;  %v276_v20 = vmov 683565275   ;;  %v277_v22 = vmov 2475754826   ;;  %s337_s1 = inlined_call_operand.vmem [shape: f32[8,1], index: 1, kind: input, shape index: {}]   ;;  %s338_s0 = inlined_call_operand.vmem [shape: f32[1,8], index: 0, kind: input, shape index: {}]   ;;  %s339_s2 = inlined_call_operand.vmem [shape: f32[17,8], index: 2, kind: output, shape index: {}]  }
   0x1   :  { %270 = vset.pattern.permute.xlu0 %v275_v0  ;;  %v12_v1 = vld [vmem:[%s337_s1] sm:$0xff]  ;;  %v278_v25 = vmov 2131351028   ;;  %v279_v28 = vmov 2102212464  }
   0x2   :  { %v13_v2 = vmul.f32 6.2831855, %v12_v1  ;;  %v21_v4 = vshrl.u32 %v20_v3, 7  ;;  %v303_v6 = vld [vmem:[%s338_s0] sm:$0x1] }
   0x3   :  { %v280_v31 = vmov 920167782   ;;  %v281_v34 = vmov 1326507024  }
   0x4   :  { %16 = vperm.xlu0 %270, %v13_v2   ;;  %v22_v5 = vsub.s32 0, %v21_v4 }
   0x6   :  { %v23_v7 = vrot.slane %v303_v6, %v22_v5 }
  0x83   :  { %v17_v8 = vpop.permute.xlu0 %16 }
  0x84   :  { %v306_v9 = vmul.f32 %v23_v7, %v17_v8 }
  0x86   :  { %v29_v10 = vand.u32 2139095040, %v306_v9  ;;  %v26_v14 = vand.u32 2147483647, %v306_v9  ;;  %vm28_vm7 = vcmp.lt.s32.totalorder %v306_v9, 0  ;;  %vm118_vm15 = vweird.f32 %v306_v9 }
  0x88   :  { %v30_v11 = vshrl.u32 %v29_v10, 23  ;;  %v33_v17 = vand.u32 8388607, %v26_v14  ;;  %vm27_vm8 = vcmp.le.f32.partialorder %v26_v14, 0.7853982 }
  0x8a   :  { %v251_v12 = vadd.s32 4294967169, %v30_v11  ;;  %v34_v36 = vor.u32 8388608, %v33_v17 }
  0x8c   :  { %v36_v13 = vadd.s32 1, %v251_v12  ;;  %v74_v50 = vshll.u32 %v34_v36, 8 }
  0x8e   :  { %vm37_vm0 = vcmp.gt.s32.totalorder %v36_v13, 0 }
  0x8f   :  { %v38_v15 = vsel %vm37_vm0, %v36_v13, 0  ;;  %vm239_vm0 = vcmask 1040384  }
  0x90   :  { %v40_v16 = vand.u32 31, %v38_v15  ;;  %v39_v19 = vshrl.u32 %v38_v15, 5 }
  0x92   :  { %v41_v18 = vsub.s32 32, %v40_v16  ;;  %v43_v21 = vshll.u32 %v276_v20, %v40_v16  ;;  %v46_v23 = vshll.u32 %v277_v22, %v40_v16  ;;  %v49_v27 = vshll.u32 %v278_v25, %v40_v16 }
  0x93   :  { %v52_v30 = vshll.u32 %v279_v28, %v40_v16  ;;  %v55_v33 = vshll.u32 %v280_v31, %v40_v16  ;;  %vm58_vm1 = vcmp.lt.s32.totalorder %v39_v19, 1  ;;  %vm61_vm2 = vcmp.lt.s32.totalorder %v39_v19, 4 }
  0x94   :  { %v44_v24 = vshrl.u32 %v277_v22, %v41_v18  ;;  %v47_v26 = vshrl.u32 %v278_v25, %v41_v18  ;;  %v50_v29 = vshrl.u32 %v279_v28, %v41_v18  ;;  %v53_v32 = vshrl.u32 %v280_v31, %v41_v18 }
  0x95   :  { %v56_v35 = vshrl.u32 %v281_v34, %v41_v18  ;;  %v42_v45 = vshrl.u32 %v276_v20, %v41_v18  ;;  %vm60_vm3 = vcmp.lt.s32.totalorder %v39_v19, 3  ;;  %vm59_vm4 = vcmp.lt.s32.totalorder %v39_v19, 2 }
  0x96   :  { %v45_v37 = vor.u32 %v44_v24, %v43_v21  ;;  %v48_v38 = vor.u32 %v47_v26, %v46_v23  ;;  %v51_v39 = vor.u32 %v50_v29, %v49_v27  ;;  %v54_v40 = vor.u32 %v53_v32, %v52_v30 }
  0x97   :  { %v57_v41 = vor.u32 %v56_v35, %v55_v33 }
  0x98   :  { %v63_v42 = vsel %vm61_vm2, %v51_v39, 2102212464  ;;  %v66_v43 = vsel %vm58_vm1, %v45_v37, %v48_v38  ;;  %v70_v44 = vsel %vm58_vm1, %v48_v38, %v51_v39  ;;  %v67_v46 = vsel %vm61_vm2, %v54_v40, 920167782 }
  0x99   :  { %v71_v47 = vsel %vm61_vm2, %v57_v41, 1326507024  ;;  %v68_v48 = vsel %vm60_vm3, %v51_v39, %v67_v46  ;;  %v62_v51 = vsel %vm58_vm1, %v42_v45, %v45_v37  ;;  %v64_v52 = vsel %vm60_vm3, %v48_v38, %v63_v42 }
  0x9a   :  { %v72_v49 = vsel %vm60_vm3, %v54_v40, %v71_v47  ;;  %v69_v53 = vsel %vm59_vm4, %v66_v43, %v68_v48  ;;  %v65_v59 = vsel %vm59_vm4, %v62_v51, %v64_v52  ;;  %vm245_vm1 = vcmask 57344  }
  0x9b   :  { %v73_v54 = vsel %vm59_vm4, %v70_v44, %v72_v49  ;;  %v315_v57 = vmul.u32.u64.low %v74_v50, %v69_v53  ;;  %v316_v58 = vmul.u32.u64.high %v74_v50, %v69_v53, %v315_v57  ;;  %v81_v61 = vmul.u32 %v74_v50, %v65_v59 }
  0x9c   :  { %v312_v55 = vmul.u32.u64.low %v74_v50, %v73_v54  ;;  %v313_v56 = vmul.u32.u64.high %v74_v50, %v73_v54, %v312_v55  ;;  %vm242_vm2 = vcmask 64512  }
  0x9d   :  { %v84_v60 = vadd.s32 1, %v316_v58 }
  0x9e   :  { %vm83_vm5 = vc.u32 %v313_v56, %v315_v57  ;;  %v82_v11 = vadd.s32 %v315_v57, %v313_v56 }
  0x9f   :  { %v85_v62 = vsel %vm83_vm5, %v84_v60, %v316_v58 }
  0xa0   :  { %v86_v63 = vadd.s32 %v85_v62, %v81_v61 }
  0xa2   :  { %v87_v0 = vadd.s32 536870912, %v86_v63 }
  0xa4   :  { %v88_v1 = vshrl.u32 %v87_v0, 30 }
  0xa6   :  { %v89_v2 = vshll.u32 %v88_v1, 30  ;;  %v112_v24 = vsub.s32 4, %v88_v1 }
  0xa8   :  { %v90_v3 = vsub.s32 %v86_v63, %v89_v2  ;;  %v113_v27 = vsel %vm28_vm7, %v112_v24, %v88_v1 }
  0xa9   :  { %v115_v29 = vsel %vm27_vm8, 0, %v113_v27 }
  0xaa   :  { %v92_v4 = vsub.s32 0, %v90_v3  ;;  %v119_v30 = vadd.s32 3, %v115_v29  ;;  %v223_v32 = vand.u32 3, %v115_v29 }
  0xac   :  { %v252_v5 = vmin.u32 %v92_v4, %v90_v3  ;;  %v120_v31 = vand.u32 3, %v119_v30  ;;  %vm228_vm10 = vcmp.eq.s32.totalorder %v223_v32, 2  ;;  %vm225_vm12 = vcmp.eq.s32.totalorder %v223_v32, 0 }
  0xad   :  { %vm224_vm14 = vcmp.lt.s32.totalorder %v223_v32, 2 }
  0xae   :  { %v94_v7 = vclz %v252_v5  ;;  %vm125_vm9 = vcmp.eq.s32.totalorder %v120_v31, 2  ;;  %vm122_vm11 = vcmp.eq.s32.totalorder %v120_v31, 0  ;;  %vm121_vm13 = vcmp.lt.s32.totalorder %v120_v31, 2 }
  0xb0   :  { %v253_v8 = vadd.s32 4294967294, %v94_v7 }
  0xb2   :  { %vm254_vm6 = vcmp.lt.s32.totalorder %v253_v8, 0 }
  0xb3   :  { %v97_v10 = vsel %vm254_vm6, 0, %v253_v8 }
  0xb4   :  { %v98_v12 = vsub.s32 32, %v97_v10  ;;  %v102_v13 = vsub.s32 4294967266, %v97_v10  ;;  %v99_v15 = vshll.u32 %v90_v3, %v97_v10 }
  0xb6   :  { %v100_v16 = vshrl.u32 %v82_v11, %v98_v12  ;;  %v103_v17 = vadd.s32 127, %v102_v13 }
  0xb8   :  { %v101_v18 = vor.u32 %v100_v16, %v99_v15  ;;  %v104_v19 = vshll.u32 %v103_v17, 23 }
  0xba   :  { %v105_v20 = vor.u32 4788187, %v104_v19  ;;  %v108_v22 = vcvt.s32.f32 %v101_v18 }
  0xbc   :  { %v106_v21 = vand.u32 2147483647, %v105_v20 }
  0xbe   :  { %v109_v23 = vmul.f32 %v108_v22, %v106_v21 }
  0xc0   :  { %v110_v25 = vxor.u32 2147483648, %v109_v23 }
  0xc2   :  { %v111_v26 = vsel %vm28_vm7, %v110_v25, %v109_v23 }
  0xc3   :  { %v114_v28 = vsel %vm27_vm8, %v306_v9, %v111_v26 }
  0xc4   :  { %271 = vcosq.f32 %v114_v28 }
  0xc5   :  { %273 = vsinq.f32 %v114_v28 }
  0xce   :  { %v272_v33 = vpop.eup %271 }
  0xcf   :  { %v274_v34 = vpop.eup %273  ;;  %v126_v35 = vxor.u32 2147483648, %v272_v33 }
  0xd0   :  { %v123_v36 = vxor.u32 2147483648, %v274_v34 }
  0xd1   :  { %v127_v37 = vsel %vm125_vm9, %v126_v35, %v274_v34  ;;  %v230_v14 = vsel %vm228_vm10, %v126_v35, %v274_v34 }
  0xd2   :  { %v124_v38 = vsel %vm122_vm11, %v272_v33, %v123_v36  ;;  %v227_v39 = vsel %vm225_vm12, %v272_v33, %v123_v36 }
  0xd3   :  { %v128_v40 = vsel %vm121_vm13, %v124_v38, %v127_v37  ;;  %v231_v41 = vsel %vm224_vm14, %v227_v39, %v230_v14 }
  0xd4   :  { %v129_v42 = vsel %vm118_vm15, nan, %v128_v40  ;;  %v232_v43 = vsel %vm118_vm15, nan, %v231_v41 }
  0xd5   :  { %v234_v44 = vrot.slane %v129_v42, 7  ;;  %v237_v45 = vrot.slane %v232_v43, 7 }
  0xd7   :  { %v240_v46 = vsel %vm239_vm0, %v303_v6, %v234_v44  ;;  %v241_v47 = vsel %vm239_vm0, %v234_v44, %v237_v45  ;;  %246 = vst.msk [vmem:[%s339_s2 + $0x10] sm:$0x1] %vm245_vm1, %v237_v45 }
  0xd8   :  { %243 = vst.msk [vmem:[%s339_s2] sm:$0xff] %vm242_vm2, %v240_v46  ;;  %244 = vst.msk [vmem:[%s339_s2 + $0x8] sm:$0xff] %vm242_vm2, %v241_v47 }

</bundles_post_ra>
